<compile_context>
chip_gen: v6e
topology: v6e:2x2x1
jax: 0.10.0
libtpu: 0.0.40
codegen_flags: <defaults>
</compile_context>

<pallas_src>
import functools

import jax
import jax.numpy as jnp
from jax.experimental import pallas as pl
from jax.experimental.pallas import tpu as pltpu


def _conv_mm_kernel(p_ref, w_ref, o_ref):
    # p_ref: (Kpad, H*W)   im2col patches for one batch element (lane dim = H*W)
    # w_ref: (Cout, Kpad)  flattened + zero-padded weights
    # o_ref: (Cout, H*W)   lane-dense output block (row-major H*W == NCHW layout)
    o_ref[...] = jnp.dot(
        w_ref[...], p_ref[...], preferred_element_type=jnp.float32
    ).astype(o_ref.dtype)


@functools.partial(jax.jit, static_argnames=("kernel_size", "compute_dtype"))
def conv2d_same_reflect(x_nchw, weight_oihw, *, kernel_size,
                        compute_dtype=jnp.float32):
    """PyTorch-equivalent Conv2d(padding='same', padding_mode='reflect', bias=False).

    x_nchw:      (N, Cin, H, W)      float32
    weight_oihw: (Cout, Cin, KH, KW) float32 (PyTorch weight layout)
    returns:     (N, Cout, H, W)     x_nchw.dtype
    """
    KH, KW = kernel_size
    N, Cin, H, W = x_nchw.shape
    Cout = weight_oihw.shape[0]
    HW = H * W
    K = Cin * KH * KW
    # Pad contraction dim up to a multiple of 128 (lane width): dense vregs /
    # dense MXU feed; zero padding is numerically exact.
    Kpad = ((K + 127) // 128) * 128

    # --- glue: 'same' reflect padding (torch: left = (k-1)//2, right = rest)
    pad_top, pad_bot = (KH - 1) // 2, (KH - 1) - (KH - 1) // 2
    pad_left, pad_right = (KW - 1) // 2, (KW - 1) - (KW - 1) // 2
    x_pad = jnp.pad(
        x_nchw,
        ((0, 0), (0, 0), (pad_top, pad_bot), (pad_left, pad_right)),
        mode="reflect",
    )

    # --- glue: im2col, K index ordering = (cin, kh, kw) to match weight reshape.
    taps = [x_pad[:, :, kh:kh + H, kw:kw + W]       # each (N, Cin, H, W)
            for kh in range(KH) for kw in range(KW)]
    patches = jnp.stack(taps, axis=2)               # (N, Cin, KH*KW, H, W)
    patches = patches.reshape(N, K, HW)
    patches = jnp.pad(patches, ((0, 0), (0, Kpad - K), (0, 0)))
    patches = patches.astype(compute_dtype)         # (N, Kpad, HW)

    w_mat = weight_oihw.reshape(Cout, K)
    w_mat = jnp.pad(w_mat, ((0, 0), (0, Kpad - K))).astype(compute_dtype)

    itemsize = jnp.dtype(compute_dtype).itemsize
    out_itemsize = jnp.dtype(x_nchw.dtype).itemsize
    cost = pl.CostEstimate(
        flops=2 * N * HW * Cout * K,
        transcendentals=0,
        bytes_accessed=(N * Kpad * HW + Cout * Kpad) * itemsize
        + N * Cout * HW * out_itemsize,
    )

    out = pl.pallas_call(
        _conv_mm_kernel,
        out_shape=jax.ShapeDtypeStruct((N, Cout, HW), x_nchw.dtype),
        grid=(N,),
        in_specs=[
            pl.BlockSpec((None, Kpad, HW), lambda b: (b, 0, 0)),
            pl.BlockSpec((Cout, Kpad), lambda b: (0, 0)),
        ],
        out_specs=pl.BlockSpec((None, Cout, HW), lambda b: (b, 0, 0)),
        compiler_params=pltpu.CompilerParams(
            dimension_semantics=("parallel",),
        ),
        cost_estimate=cost,
    )(patches, w_mat)

    # Already NCHW-ordered (Cout on sublanes, row-major H*W on lanes): reshape only.
    return out.reshape(N, Cout, H, W)


def xavier_uniform_selu(key, num_out, num_in, kh, kw):
    """torch.nn.init.xavier_uniform_ with gain = calculate_gain('selu') = 3/4."""
    gain = 3.0 / 4.0
    fan_in = num_in * kh * kw
    fan_out = num_out * kh * kw
    bound = gain * (6.0 / (fan_in + fan_out)) ** 0.5
    return jax.random.uniform(
        key, (num_out, num_in, kh, kw), dtype=jnp.float32,
        minval=-bound, maxval=bound,
    )


if __name__ == "__main__":
    key = jax.random.PRNGKey(0)
    kx, kw_ = jax.random.split(key)

    # Module config: Conv2d(num_in_filters=4, num_out_filters=8, kernel_size=(3,3))
    N, Cin, H, W = 2, 4, 16, 16
    Cout, KH, KW = 8, 3, 3

    x = jax.random.normal(kx, (N, Cin, H, W), dtype=jnp.float32)
    weight = xavier_uniform_selu(kw_, Cout, Cin, KH, KW)

    out = conv2d_same_reflect(x, weight, kernel_size=(KH, KW))
    out = jax.block_until_ready(out)

    # Cross-check against XLA's conv (same reflect padding applied in JAX).
    x_ref_pad = jnp.pad(x, ((0, 0), (0, 0), (1, 1), (1, 1)), mode="reflect")
    ref = jax.lax.conv_general_dilated(
        x_ref_pad, weight, window_strides=(1, 1), padding="VALID",
        dimension_numbers=("NCHW", "OIHW", "NCHW"),
        preferred_element_type=jnp.float32,
    )
    assert out.shape == (N, Cout, H, W)
    assert jnp.allclose(out, ref, atol=1e-4, rtol=1e-4), "mismatch vs reference conv"

    # bf16 compute path (v6e/v7x MXU & DMA-bandwidth win), f32 accumulation.
    out_bf16 = conv2d_same_reflect(
        x, weight, kernel_size=(KH, KW), compute_dtype=jnp.bfloat16)
    out_bf16 = jax.block_until_ready(out_bf16)
    assert jnp.allclose(out_bf16, ref, atol=5e-2, rtol=5e-2), "bf16 path mismatch"

    print("KERNEL_OK")
</pallas_src>

<mosaic_0001>
module attributes {stable_mosaic.version = 11 : i64} {
  func.func @_conv_mm_kernel(%arg0: i32, %arg1: memref<1x128x256xf32, #tpu.memory_space<vmem>>, %arg2: memref<8x128xf32, #tpu.memory_space<vmem>>, %arg3: memref<1x8x256xf32, #tpu.memory_space<vmem>>) attributes {dimension_semantics = [#tpu.dimension_semantics<parallel>], iteration_bounds = array<i64: 2>, scalar_prefetch = 0 : i64, scratch_operands = 0 : i64, tpu.core_type = #tpu.core_type<tc>, window_params = [{transform_indices = @transform_0, window_bounds = array<i64: 1, 128, 256>}, {pipeline_mode = #tpu.pipeline_mode<synchronous>, transform_indices = @transform_1, window_bounds = array<i64: 8, 128>}, {transform_indices = @transform_2, window_bounds = array<i64: 1, 8, 256>}]} {
    %c0 = arith.constant 0 : index
    %c0_0 = arith.constant 0 : index
    %0 = vector.load %arg2[%c0, %c0_0] : memref<8x128xf32, #tpu.memory_space<vmem>>, vector<8x128xf32>
    %c0_1 = arith.constant 0 : index
    %c0_2 = arith.constant 0 : index
    %c0_3 = arith.constant 0 : index
    %1 = vector.load %arg1[%c0_1, %c0_2, %c0_3] : memref<1x128x256xf32, #tpu.memory_space<vmem>>, vector<1x128x256xf32>
    %2 = vector.shape_cast %1 : vector<1x128x256xf32> to vector<128x256xf32>
    %cst = arith.constant dense<0.000000e+00> : vector<8x256xf32>
    %3 = tpu.matmul %0, %2, %cst {dimension_numbers = #tpu.dot_dimension_numbers<[1], [0], [0], [1], [0, 0, 1, 1], [], []>} : vector<8x128xf32>, vector<128x256xf32>, vector<8x256xf32> -> vector<8x256xf32>
    %c0_4 = arith.constant 0 : index
    %c0_5 = arith.constant 0 : index
    %c0_6 = arith.constant 0 : index
    %4 = vector.load %arg3[%c0_4, %c0_5, %c0_6] : memref<1x8x256xf32, #tpu.memory_space<vmem>>, vector<1x8x256xf32>
    %5 = vector.shape_cast %4 : vector<1x8x256xf32> to vector<8x256xf32>
    %6 = vector.shape_cast %3 : vector<8x256xf32> to vector<1x8x256xf32>
    tpu.vector_store %arg3[%c0_4, %c0_5, %c0_6], %6 {strides = array<i32>} : memref<1x8x256xf32, #tpu.memory_space<vmem>>, vector<1x8x256xf32>,
    return
  }
  func.func @transform_0(%arg0: i32) -> (i32, i32, i32) {
    %c0_i32 = arith.constant 0 : i32
    %c0_i32_0 = arith.constant 0 : i32
    %c0_i32_1 = arith.constant 0 : i32
    return %arg0, %c0_i32, %c0_i32_0 : i32, i32, i32
  }
  func.func @transform_1(%arg0: i32) -> (i32, i32) {
    %c0_i32 = arith.constant 0 : i32
    %c0_i32_0 = arith.constant 0 : i32
    %c0_i32_1 = arith.constant 0 : i32
    return %c0_i32, %c0_i32_0 : i32, i32
  }
  func.func @transform_2(%arg0: i32) -> (i32, i32, i32) {
    %c0_i32 = arith.constant 0 : i32
    %c0_i32_0 = arith.constant 0 : i32
    %c0_i32_1 = arith.constant 0 : i32
    return %arg0, %c0_i32, %c0_i32_0 : i32, i32, i32
  }
}

</mosaic_0001>

<bundles_post_ra>
// kernel: conv2d_same_reflect.1
= control target key start
LH: loop header
LB: loop body
LE: loop exit
PB: predicated region body
PF: predicated region fallthrough
CT: control target
= control target key end

     0   :  { %s351_s9 = smov 0   ;;  %s409_s0 = inlined_call_operand.vmem [shape: f32[2,128,256], index: 0, kind: input, shape index: {}]   ;;  %s410_s1 = inlined_call_operand.vmem [shape: f32[8,128], index: 1, kind: input, shape index: {}]   ;;  %s411_s2 = inlined_call_operand.vmem [shape: f32[2,8,256], index: 2, kind: output, shape index: {}]  }
   0x1 LB: > { %s305_s10 = sadd.s32 4294967295, %s333_s9   ;;  %p309_p0 = scmp.ge.s32.totalorder %s333_s9, 1  ;;  %s333_s9 = sphi %s351_s9, %s12_s9  }
   0x2   : > { %p112_p1 = scmp.lt.s32.totalorder %s333_s9, 3 }
   0x4   : > { %p113_p2 = pnand %p309_p0, %p112_p1 }
   0x5   : > { %p134_p3 = scmp.lt.s32.totalorder (!%p113_p2), %s305_s10, 1 }
   0x6   : > { %116 = sbr.rel (%p113_p2) target bundleno = 243 (0xf3), region = 28 }
   0xb   : > { %v335_v0 = vmov 0.0   ;;  %s413_s10 = smov (!%p134_p3, %s305_s10), 1  ;;  %v144_v33 = vld [vmem:[%s410_s1] sm:$0xff] }
   0xc   : > { %241 = vmatprep.mubr.f32.mxu0 %v335_v0  ;;  %s316_s11 = sshll.u32 %s413_s10, 8  ;;  %s317_s17 = sshll.u32 %s413_s10, 4 }
   0xd   : > { %s365_s14 = scalar_lea.vmem %s409_s0, %s316_s11  ;;  %s143_s20 = scalar_lea.vmem %s411_s2, %s317_s17 }
   0xe   : > { %v176_v1 = vld [vmem:[%s365_s14 + $0xf8] sm:$0xff]  ;;  %v175_v2 = vld [vmem:[%s365_s14 + $0xf0] sm:$0xff]  ;;  %v174_v3 = vld [vmem:[%s365_s14 + $0xe8] sm:$0xff] }
   0xf   : > { %177 = vmatprep.subr.mxu0 %v176_v1  ;;  %v173_v4 = vld [vmem:[%s365_s14 + $0xe0] sm:$0xff]  ;;  %v172_v5 = vld [vmem:[%s365_s14 + $0xd8] sm:$0xff]  ;;  %v171_v6 = vld [vmem:[%s365_s14 + $0xd0] sm:$0xff] }
  0x10   : > { %178 = vmatpush1.msra.mxu0 %v175_v2  ;;  %v170_v7 = vld [vmem:[%s365_s14 + $0xc8] sm:$0xff]  ;;  %v169_v8 = vld [vmem:[%s365_s14 + $0xc0] sm:$0xff]  ;;  %v168_v9 = vld [vmem:[%s365_s14 + $0xb8] sm:$0xff] }
  0x11   : > { %179 = vmatprep.subr.mxu0 %v174_v3  ;;  %v167_v10 = vld [vmem:[%s365_s14 + $0xb0] sm:$0xff]  ;;  %v166_v11 = vld [vmem:[%s365_s14 + $0xa8] sm:$0xff]  ;;  %v165_v12 = vld [vmem:[%s365_s14 + $0xa0] sm:$0xff] }
  0x12   : > { %180 = vmatpush1.msra.mxu0 %v173_v4  ;;  %v164_v13 = vld [vmem:[%s365_s14 + $0x98] sm:$0xff]  ;;  %v163_v14 = vld [vmem:[%s365_s14 + $0x90] sm:$0xff]  ;;  %v162_v15 = vld [vmem:[%s365_s14 + $0x88] sm:$0xff] }
  0x13   : > { %181 = vmatprep.subr.mxu0 %v172_v5  ;;  %v161_v16 = vld [vmem:[%s365_s14 + $0x80] sm:$0xff]  ;;  %v160_v17 = vld [vmem:[%s365_s14 + $0x78] sm:$0xff]  ;;  %v159_v18 = vld [vmem:[%s365_s14 + $0x70] sm:$0xff] }
  0x14   : > { %182 = vmatpush1.msra.mxu0 %v171_v6  ;;  %v158_v19 = vld [vmem:[%s365_s14 + $0x68] sm:$0xff]  ;;  %v157_v20 = vld [vmem:[%s365_s14 + $0x60] sm:$0xff]  ;;  %v156_v21 = vld [vmem:[%s365_s14 + $0x58] sm:$0xff] }
  0x15   : > { %183 = vmatprep.subr.mxu0 %v170_v7  ;;  %v155_v22 = vld [vmem:[%s365_s14 + $0x50] sm:$0xff]  ;;  %v154_v23 = vld [vmem:[%s365_s14 + $0x48] sm:$0xff]  ;;  %v153_v24 = vld [vmem:[%s365_s14 + $0x40] sm:$0xff] }
  0x16   : > { %184 = vmatpush1.msra.mxu0 %v169_v8  ;;  %v152_v25 = vld [vmem:[%s365_s14 + $0x38] sm:$0xff]  ;;  %v151_v26 = vld [vmem:[%s365_s14 + $0x30] sm:$0xff]  ;;  %v150_v27 = vld [vmem:[%s365_s14 + $0x28] sm:$0xff] }
  0x17   : > { %185 = vmatprep.subr.mxu0 %v168_v9  ;;  %v149_v28 = vld [vmem:[%s365_s14 + $0x20] sm:$0xff]  ;;  %v148_v29 = vld [vmem:[%s365_s14 + $0x18] sm:$0xff]  ;;  %v147_v30 = vld [vmem:[%s365_s14 + $0x10] sm:$0xff] }
  0x18   : > { %186 = vmatpush1.msra.mxu0 %v167_v10  ;;  %v146_v31 = vld [vmem:[%s365_s14 + $0x8] sm:$0xff]  ;;  %v145_v32 = vld [vmem:[%s365_s14] sm:$0xff] }
  0x19   : > { %187 = vmatprep.subr.mxu0 %v166_v11 }
  0x1a   : > { %188 = vmatpush1.msra.mxu0 %v165_v12 }
  0x1b   : > { %189 = vmatprep.subr.mxu0 %v164_v13 }
  0x1c   : > { %190 = vmatpush1.msra.mxu0 %v163_v14 }
  0x1d   : > { %191 = vmatprep.subr.mxu0 %v162_v15 }
  0x1e   : > { %192 = vmatpush1.msra.mxu0 %v161_v16 }
  0x1f   : > { %193 = vmatprep.subr.mxu0 %v160_v17 }
  0x20   : > { %194 = vmatpush1.msra.mxu0 %v159_v18 }
  0x21   : > { %195 = vmatprep.subr.mxu0 %v158_v19 }
  0x22   : > { %196 = vmatpush1.msra.mxu0 %v157_v20 }
  0x23   : > { %197 = vmatprep.subr.mxu0 %v156_v21 }
  0x24   : > { %198 = vmatpush1.msra.mxu0 %v155_v22 }
  0x25   : > { %199 = vmatprep.subr.mxu0 %v154_v23 }
  0x26   : > { %200 = vmatpush1.msra.mxu0 %v153_v24 }
  0x27   : > { %201 = vmatprep.subr.mxu0 %v152_v25 }
  0x28   : > { %202 = vmatpush1.msra.mxu0 %v151_v26 }
  0x29   : > { %203 = vmatprep.subr.mxu0 %v150_v27 }
  0x2a   : > { %204 = vmatpush1.msra.mxu0 %v149_v28 }
  0x2b   : > { %205 = vmatprep.subr.mxu0 %v148_v29 }
  0x2c   : > { %206 = vmatpush1.msra.mxu0 %v147_v30 }
  0x2d   : > { %207 = vmatprep.subr.mxu0 %v146_v31 }
  0x2e   : > { %208 = vmatpush1.msra.mxu0 %v145_v32 }
  0x2f   : > { %242 = vmatmul.mubr.f32.vlgmr.msra.gmra.mxu0 %v144_v33 }
  0xef   : > { %v243_v34 = vpop.f32.mrf.mxu0 }
  0xf0   : > { %248 = vst [vmem:[%s143_s20] sm:$0xff] %v243_v34 }
  0xf1   : > { %v245_v35 = vpop.f32.mrf.mxu0 }
  0xf2   : > { %249 = vst [vmem:[%s143_s20 + $0x8] sm:$0xff] %v245_v35 }
  0xf3 PF: > { %s12_s9 = sadd.s32 1, %s333_s9  }
  0xf4   : > { %p9_p4 = scmp.ge.s32.totalorder %s12_s9, 4  }
  0xf6   :  { %11 = sbr.rel (!%p9_p4) target bundleno = 1 (0x1), region = 58 }

</bundles_post_ra>
